<compile_context>
chip_gen: v7x
topology: tpu7x:2x2x1
jax: 0.10.0
libtpu: 0.0.40
codegen_flags: <defaults>
</compile_context>

<pallas_src>
import functools

import jax
import jax.numpy as jnp
from jax import lax
from jax.experimental import pallas as pl
from jax.experimental.pallas import tpu as pltpu


# ---------------------------------------------------------------------------
# Fused Pallas kernel: all TemporalBlocks + classifier, TB samples per step.
# ---------------------------------------------------------------------------
def _tcn_fused_kernel(x_ref, wp_ref, wc_ref, mk_ref, o_ref, cls_scr, h_scr, *,
                      meta, ksize, L, TB, Lr, shift_row):
    """One grid step processes TB batch samples.

    x_ref  : [cin0, TB*L]   sample t occupies lanes [t*L, (t+1)*L)
    wp_ref : [8*NB, CW]     packed conv weights; block b at rows [8b, 8b+8);
                            tap j at cols [j*cin, (j+1)*cin), bias at col k*cin
    wc_ref : [Lr+8, C]      classifier: rows [0, L) = W^T, row Lr = bias
    mk_ref : [S, TB*L]      0/1 causal masks, one row per distinct nonzero shift
    o_ref  : [TB, C]
    cls_scr: [TB, L]        scratch to gather per-sample frames for classifier
    h_scr  : [1, TB*L]      scratch holding the last layer's (1-channel) output
    """

    def tap(h, s):
        if s == 0:
            return h
        # pltpu.roll == jnp.roll semantics: result[:, i] = h[:, i - s].  The
        # precomputed mask zeroes the first s frames of EVERY sample, which
        # also kills cross-sample / wraparound bleed from the rotation.
        r = shift_row[s]
        return pltpu.roll(h, s, 1) * mk_ref[r:r + 1, :]

    def conv(h, block, cin, cout, ktaps, dil):
        r0 = 8 * block
        acc = None
        for j in range(ktaps):
            w = wp_ref[r0:r0 + cout, j * cin:(j + 1) * cin]      # [cout, cin]
            t = tap(h, (ktaps - 1 - j) * dil)                    # [cin, TB*L]
            if cin == 1:
                c = w * t                      # outer product on the VPU
            else:
                c = jnp.dot(w, t, preferred_element_type=jnp.float32)
            acc = c if acc is None else acc + c
        bias = wp_ref[r0:r0 + cout, ktaps * cin:ktaps * cin + 1]  # [cout, 1]
        return acc + bias

    h = x_ref[...].astype(jnp.float32)                           # [cin0, TB*L]
    blk = 0
    for (cin, cout, dil, has_ds) in meta:
        # conv1 -> ReLU   (dropout == identity, eval mode)
        g = jnp.maximum(conv(h, blk, cin, cout, ksize, dil), 0.0)
        blk += 1
        # conv2 -> ReLU
        g = jnp.maximum(conv(g, blk, cout, cout, ksize, dil), 0.0)
        blk += 1
        # residual (added AFTER relu2, per the reference module)
        if has_ds:
            res = conv(h, blk, cin, cout, 1, 1)
            blk += 1
        else:
            res = h
        h = jnp.maximum(g + res, 0.0)

    # Classifier: last layer has cout == 1, so h is [1, TB*L].  Gather the TB
    # per-sample frame rows into one [TB, L] tile (via a ref so the lane slices
    # are plain memory slices) and do a single [TB, L] @ [L, C] matmul.
    h_scr[...] = h
    for t in range(TB):
        cls_scr[t:t + 1, :] = h_scr[0:1, t * L:(t + 1) * L]
    out = jnp.dot(cls_scr[...], wc_ref[0:L, :],
                  preferred_element_type=jnp.float32) + wc_ref[Lr:Lr + 1, :]
    o_ref[...] = out


def _choose_batch_block(B, L, max_lanes=2048, min_steps=2):
    """Largest TB dividing B with TB*L <= max_lanes; prefers >= min_steps grid
    steps (v7x has 2 TensorCores) and a lane extent that is a multiple of 128."""
    cap = max(1, max_lanes // max(L, 1))
    divs = [d for d in range(1, B + 1) if B % d == 0 and d <= cap] or [1]
    cands = [d for d in divs if B // d >= min_steps] or divs
    dense = [d for d in cands if (d * L) % 128 == 0]
    return max(dense) if dense else max(cands)


def tcn_forward(x_ncl, kparams, *, kernel_size, batch_block=None):
    """x_ncl: [B, num_inputs, frames] (PyTorch NCL).  Returns [B, num_class]."""
    B, cin0, L = x_ncl.shape
    meta = tuple(kparams["meta"])               # (cin, cout, dilation, has_ds)
    assert meta[-1][1] == 1, "last num_channels entry must be 1 (module squeezes dim=1)"

    TB = batch_block if batch_block is not None else _choose_batch_block(B, L)
    assert B % TB == 0, (B, TB)
    G = B // TB
    N = TB * L
    num_class = kparams["wc_pack"].shape[1]
    Lr = kparams["Lr"]

    # [B, C, L] -> [C, B*L]: channels on sublanes, (batch, time) on lanes.
    xk = jnp.transpose(x_ncl, (1, 0, 2)).reshape(cin0, B * L)

    # Precomputed 0/1 causal masks, one row per distinct nonzero shift, so the
    # kernel needs no per-lane iota / mod.
    shifts = sorted({(kernel_size - 1 - j) * d
                     for (_, _, d, _) in meta for j in range(kernel_size)} - {0})
    shift_row = {s: i for i, s in enumerate(shifts)}
    pos = jnp.tile(jnp.arange(L, dtype=jnp.int32), TB)[None, :]          # [1, N]
    if shifts:
        masks = (pos >= jnp.asarray(shifts, jnp.int32)[:, None]).astype(jnp.float32)
    else:
        masks = jnp.ones((1, N), jnp.float32)

    def _const(a):
        # constant-index full-array spec: DMA'd once, reused for every step.
        return pl.BlockSpec(a.shape, lambda b, n=a.ndim: (0,) * n)

    kern = functools.partial(_tcn_fused_kernel, meta=meta, ksize=kernel_size,
                             L=L, TB=TB, Lr=Lr, shift_row=shift_row)
    out = pl.pallas_call(
        kern,
        out_shape=jax.ShapeDtypeStruct((B, num_class), jnp.float32),
        grid=(G,),
        in_specs=[pl.BlockSpec((cin0, N), lambda b: (0, b)),
                  _const(kparams["wpack"]),
                  _const(kparams["wc_pack"]),
                  _const(masks)],
        out_specs=pl.BlockSpec((TB, num_class), lambda b: (b, 0)),
        scratch_shapes=[pltpu.VMEM((TB, L), jnp.float32),
                        pltpu.VMEM((1, N), jnp.float32)],
        compiler_params=pltpu.CompilerParams(
            dimension_semantics=("parallel",)),     # v7x: batch over both TCs
    )(xk, kparams["wpack"], kparams["wc_pack"], masks)
    return out


# ---------------------------------------------------------------------------
# Parameter init (deterministic, torch layout) and kernel-layout packing.
# ---------------------------------------------------------------------------
def init_params(key, num_inputs, num_channels, num_class, frames, kernel_size):
    """Weights in PyTorch layout: conv [Cout, Cin, k], linear [num_class, frames]."""
    params = {"blocks": []}
    for i, cout in enumerate(num_channels):
        cin = num_inputs if i == 0 else num_channels[i - 1]
        key, k1, k2, k3, k4, k5, k6 = jax.random.split(key, 7)
        blk = {
            # weight_norm(v) with default g = ||v|| reproduces v exactly, so
            # the effective conv weight equals the initialized tensor.
            "w1": 0.01 * jax.random.normal(k1, (cout, cin, kernel_size), jnp.float32),
            "b1": 0.01 * jax.random.normal(k2, (cout,), jnp.float32),
            "w2": 0.01 * jax.random.normal(k3, (cout, cout, kernel_size), jnp.float32),
            "b2": 0.01 * jax.random.normal(k4, (cout,), jnp.float32),
        }
        if cin != cout:
            blk["wd"] = 0.01 * jax.random.normal(k5, (cout, cin, 1), jnp.float32)
            blk["bd"] = 0.01 * jax.random.normal(k6, (cout,), jnp.float32)
        else:
            blk["wd"] = None
            blk["bd"] = None
        params["blocks"].append(blk)
    key, k1, k2 = jax.random.split(key, 3)
    params["wc"] = 0.1 * jax.random.normal(k1, (num_class, frames), jnp.float32)
    params["bc"] = 0.1 * jax.random.normal(k2, (num_class,), jnp.float32)
    return params


def to_kernel_layout(params, num_inputs, num_channels, kernel_size, frames, num_class):
    """Torch layout -> single packed weight array + packed classifier.

    NOTE(weight_norm): exact only when g == ||v|| (true at PyTorch init).  For
    trained checkpoints, fold g * v / ||v|| into w1/w2 before calling this.
    """
    k = kernel_size
    meta, conv_blocks = [], []

    def pack_conv(w_oik, b_o):              # w [cout, cin, ktaps], b [cout]
        ktaps = w_oik.shape[2]
        cols = [w_oik[:, :, j] for j in range(ktaps)] + [b_o[:, None]]
        return jnp.concatenate(cols, axis=1)          # [cout, ktaps*cin + 1]

    for i, blk in enumerate(params["blocks"]):
        cin = num_inputs if i == 0 else num_channels[i - 1]
        cout = num_channels[i]
        has_ds = blk["wd"] is not None
        meta.append((cin, cout, 2 ** i, has_ds))
        conv_blocks.append(pack_conv(blk["w1"], blk["b1"]))
        conv_blocks.append(pack_conv(blk["w2"], blk["b2"]))
        if has_ds:
            conv_blocks.append(pack_conv(blk["wd"], blk["bd"]))

    cw = max(b.shape[1] for b in conv_blocks)
    wpack = jnp.zeros((8 * len(conv_blocks), cw), jnp.float32)
    for bi, b in enumerate(conv_blocks):
        wpack = wpack.at[8 * bi:8 * bi + b.shape[0], :b.shape[1]].set(b)

    lr = -(-frames // 8) * 8                          # 8-aligned bias row
    wc_pack = jnp.zeros((lr + 8, num_class), jnp.float32)
    wc_pack = wc_pack.at[:frames, :].set(params["wc"].T)   # [frames, num_class]
    wc_pack = wc_pack.at[lr, :].set(params["bc"])
    return {"wpack": wpack, "wc_pack": wc_pack, "meta": meta, "Lr": lr}


# ---------------------------------------------------------------------------
# Pure-JAX reference (torch semantics) for the correctness check.
# ---------------------------------------------------------------------------
def _ref_conv(x, w, b, dilation, pad):
    y = lax.conv_general_dilated(
        x, w, window_strides=(1,), padding=[(pad, pad)],
        rhs_dilation=(dilation,), dimension_numbers=("NCH", "OIH", "NCH"))
    return y + b[None, :, None]


def ref_forward(x_ncl, params, *, kernel_size):
    x = x_ncl
    L = x.shape[-1]
    for i, blk in enumerate(params["blocks"]):
        d = 2 ** i
        pad = (kernel_size - 1) * d
        h = _ref_conv(x, blk["w1"], blk["b1"], d, pad)[:, :, :L]    # chomp
        h = jnp.maximum(h, 0.0)
        g = _ref_conv(h, blk["w2"], blk["b2"], d, pad)[:, :, :L]    # chomp
        g = jnp.maximum(g, 0.0)
        res = x if blk["wd"] is None else _ref_conv(x, blk["wd"], blk["bd"], 1, 0)
        x = jnp.maximum(g + res, 0.0)
    y = jnp.squeeze(x, axis=1)
    return y @ params["wc"].T + params["bc"]


# ---------------------------------------------------------------------------
if __name__ == "__main__":
    # Small config consistent with the module's forward:
    #   x: [batch, num_inputs, frames]; last num_channels entry = 1 so that
    #   torch.squeeze(dim=1) -> [batch, frames] feeds Linear(frames, num_class).
    batch, num_inputs, frames = 16, 4, 16
    num_channels = [8, 8, 1]
    num_class = 5
    kernel_size = 2

    key = jax.random.PRNGKey(0)
    key, kx, kp = jax.random.split(key, 3)
    x = jax.random.normal(kx, (batch, num_inputs, frames), jnp.float32)

    params = init_params(kp, num_inputs, num_channels, num_class, frames,
                         kernel_size)
    kparams = to_kernel_layout(params, num_inputs, num_channels, kernel_size,
                               frames, num_class)

    out = tcn_forward(x, kparams, kernel_size=kernel_size)
    out = jax.block_until_ready(out)

    ref = ref_forward(x, params, kernel_size=kernel_size)
    assert out.shape == (batch, num_class), out.shape
    assert jnp.allclose(out, ref, atol=1e-4, rtol=1e-4), (
        f"mismatch: max err {jnp.max(jnp.abs(out - ref))}")

    print("KERNEL_OK")
</pallas_src>

<mosaic_0001>
module attributes {stable_mosaic.version = 11 : i64} {
  func.func @_tcn_fused_kernel(%arg0: i32, %arg1: memref<4x128xf32, #tpu.memory_space<vmem>>, %arg2: memref<64x17xf32, #tpu.memory_space<vmem>>, %arg3: memref<24x5xf32, #tpu.memory_space<vmem>>, %arg4: memref<3x128xf32, #tpu.memory_space<vmem>>, %arg5: memref<8x5xf32, #tpu.memory_space<vmem>>, %arg6: memref<8x16xf32, #tpu.memory_space<vmem>>, %arg7: memref<1x128xf32, #tpu.memory_space<vmem>>) attributes {dimension_semantics = [#tpu.dimension_semantics<parallel>], iteration_bounds = array<i64: 2>, scalar_prefetch = 0 : i64, scratch_operands = 2 : i64, tpu.core_type = #tpu.core_type<tc>, window_params = [{transform_indices = @transform_0, window_bounds = array<i64: 4, 128>}, {pipeline_mode = #tpu.pipeline_mode<synchronous>, transform_indices = @transform_1, window_bounds = array<i64: 64, 17>}, {pipeline_mode = #tpu.pipeline_mode<synchronous>, transform_indices = @transform_2, window_bounds = array<i64: 24, 5>}, {pipeline_mode = #tpu.pipeline_mode<synchronous>, transform_indices = @transform_3, window_bounds = array<i64: 3, 128>}, {transform_indices = @transform_4, window_bounds = array<i64: 8, 5>}]} {
    %c0 = arith.constant 0 : index
    %c0_0 = arith.constant 0 : index
    %0 = vector.load %arg1[%c0, %c0_0] : memref<4x128xf32, #tpu.memory_space<vmem>>, vector<4x128xf32>
    %c0_1 = arith.constant 0 : index
    %c0_2 = arith.constant 0 : index
    %1 = vector.load %arg2[%c0_1, %c0_2] : memref<64x17xf32, #tpu.memory_space<vmem>>, vector<8x4xf32>
    %c1_i32 = arith.constant 1 : i32
    %2 = tpu.dynamic_rotate %0 by %c1_i32 dim 1 : vector<4x128xf32>, i32 -> vector<4x128xf32>
    %c0_3 = arith.constant 0 : index
    %c0_4 = arith.constant 0 : index
    %3 = vector.load %arg4[%c0_3, %c0_4] : memref<3x128xf32, #tpu.memory_space<vmem>>, vector<1x128xf32>
    %4 = vector.broadcast %3 : vector<1x128xf32> to vector<4x128xf32>
    %5 = arith.mulf %2, %4 : vector<4x128xf32>
    %cst = arith.constant dense<0.000000e+00> : vector<8x128xf32>
    %6 = tpu.matmul %1, %5, %cst {dimension_numbers = #tpu.dot_dimension_numbers<[1], [0], [0], [1], [0, 0, 1, 1], [], []>} : vector<8x4xf32>, vector<4x128xf32>, vector<8x128xf32> -> vector<8x128xf32>
    %c0_5 = arith.constant 0 : index
    %c4 = arith.constant 4 : index
    %7 = vector.load %arg2[%c0_5, %c4] : memref<64x17xf32, #tpu.memory_space<vmem>>, vector<8x4xf32>
    %cst_6 = arith.constant dense<0.000000e+00> : vector<8x128xf32>
    %8 = tpu.matmul %7, %0, %cst_6 {dimension_numbers = #tpu.dot_dimension_numbers<[1], [0], [0], [1], [0, 0, 1, 1], [], []>} : vector<8x4xf32>, vector<4x128xf32>, vector<8x128xf32> -> vector<8x128xf32>
    %9 = arith.addf %6, %8 : vector<8x128xf32>
    %c0_7 = arith.constant 0 : index
    %c8 = arith.constant 8 : index
    %10 = vector.load %arg2[%c0_7, %c8] : memref<64x17xf32, #tpu.memory_space<vmem>>, vector<8x1xf32>
    %11 = vector.broadcast %10 : vector<8x1xf32> to vector<8x128xf32>
    %12 = arith.addf %9, %11 : vector<8x128xf32>
    %cst_8 = arith.constant 0.000000e+00 : f32
    %13 = vector.broadcast %cst_8 : f32 to vector<8x128xf32>
    %14 = arith.maximumf %12, %13 : vector<8x128xf32>
    %c8_9 = arith.constant 8 : index
    %c0_10 = arith.constant 0 : index
    %15 = vector.load %arg2[%c8_9, %c0_10] : memref<64x17xf32, #tpu.memory_space<vmem>>, vector<8x8xf32>
    %c1_i32_11 = arith.constant 1 : i32
    %16 = tpu.dynamic_rotate %14 by %c1_i32_11 dim 1 : vector<8x128xf32>, i32 -> vector<8x128xf32>
    %c0_12 = arith.constant 0 : index
    %c0_13 = arith.constant 0 : index
    %17 = vector.load %arg4[%c0_12, %c0_13] : memref<3x128xf32, #tpu.memory_space<vmem>>, vector<1x128xf32>
    %18 = vector.broadcast %17 : vector<1x128xf32> to vector<8x128xf32>
    %19 = arith.mulf %16, %18 : vector<8x128xf32>
    %cst_14 = arith.constant dense<0.000000e+00> : vector<8x128xf32>
    %20 = tpu.matmul %15, %19, %cst_14 {dimension_numbers = #tpu.dot_dimension_numbers<[1], [0], [0], [1], [0, 0, 1, 1], [], []>} : vector<8x8xf32>, vector<8x128xf32>, vector<8x128xf32> -> vector<8x128xf32>
    %c8_15 = arith.constant 8 : index
    %c8_16 = arith.constant 8 : index
    %21 = vector.load %arg2[%c8_15, %c8_16] : memref<64x17xf32, #tpu.memory_space<vmem>>, vector<8x8xf32>
    %cst_17 = arith.constant dense<0.000000e+00> : vector<8x128xf32>
    %22 = tpu.matmul %21, %14, %cst_17 {dimension_numbers = #tpu.dot_dimension_numbers<[1], [0], [0], [1], [0, 0, 1, 1], [], []>} : vector<8x8xf32>, vector<8x128xf32>, vector<8x128xf32> -> vector<8x128xf32>
    %23 = arith.addf %20, %22 : vector<8x128xf32>
    %c8_18 = arith.constant 8 : index
    %c16 = arith.constant 16 : index
    %24 = vector.load %arg2[%c8_18, %c16] : memref<64x17xf32, #tpu.memory_space<vmem>>, vector<8x1xf32>
    %25 = vector.broadcast %24 : vector<8x1xf32> to vector<8x128xf32>
    %26 = arith.addf %23, %25 : vector<8x128xf32>
    %cst_19 = arith.constant 0.000000e+00 : f32
    %27 = vector.broadcast %cst_19 : f32 to vector<8x128xf32>
    %28 = arith.maximumf %26, %27 : vector<8x128xf32>
    %c16_20 = arith.constant 16 : index
    %c0_21 = arith.constant 0 : index
    %29 = vector.load %arg2[%c16_20, %c0_21] : memref<64x17xf32, #tpu.memory_space<vmem>>, vector<8x4xf32>
    %cst_22 = arith.constant dense<0.000000e+00> : vector<8x128xf32>
    %30 = tpu.matmul %29, %0, %cst_22 {dimension_numbers = #tpu.dot_dimension_numbers<[1], [0], [0], [1], [0, 0, 1, 1], [], []>} : vector<8x4xf32>, vector<4x128xf32>, vector<8x128xf32> -> vector<8x128xf32>
    %c16_23 = arith.constant 16 : index
    %c4_24 = arith.constant 4 : index
    %31 = vector.load %arg2[%c16_23, %c4_24] : memref<64x17xf32, #tpu.memory_space<vmem>>, vector<8x1xf32>
    %32 = vector.broadcast %31 : vector<8x1xf32> to vector<8x128xf32>
    %33 = arith.addf %30, %32 : vector<8x128xf32>
    %34 = arith.addf %28, %33 : vector<8x128xf32>
    %cst_25 = arith.constant 0.000000e+00 : f32
    %35 = vector.broadcast %cst_25 : f32 to vector<8x128xf32>
    %36 = arith.maximumf %34, %35 : vector<8x128xf32>
    %c24 = arith.constant 24 : index
    %c0_26 = arith.constant 0 : index
    %37 = vector.load %arg2[%c24, %c0_26] : memref<64x17xf32, #tpu.memory_space<vmem>>, vector<8x8xf32>
    %c2_i32 = arith.constant 2 : i32
    %38 = tpu.dynamic_rotate %36 by %c2_i32 dim 1 : vector<8x128xf32>, i32 -> vector<8x128xf32>
    %c1 = arith.constant 1 : index
    %c0_27 = arith.constant 0 : index
    %39 = vector.load %arg4[%c1, %c0_27] : memref<3x128xf32, #tpu.memory_space<vmem>>, vector<1x128xf32>
    %40 = vector.broadcast %39 : vector<1x128xf32> to vector<8x128xf32>
    %41 = arith.mulf %38, %40 : vector<8x128xf32>
    %cst_28 = arith.constant dense<0.000000e+00> : vector<8x128xf32>
    %42 = tpu.matmul %37, %41, %cst_28 {dimension_numbers = #tpu.dot_dimension_numbers<[1], [0], [0], [1], [0, 0, 1, 1], [], []>} : vector<8x8xf32>, vector<8x128xf32>, vector<8x128xf32> -> vector<8x128xf32>
    %c24_29 = arith.constant 24 : index
    %c8_30 = arith.constant 8 : index
    %43 = vector.load %arg2[%c24_29, %c8_30] : memref<64x17xf32, #tpu.memory_space<vmem>>, vector<8x8xf32>
    %cst_31 = arith.constant dense<0.000000e+00> : vector<8x128xf32>
    %44 = tpu.matmul %43, %36, %cst_31 {dimension_numbers = #tpu.dot_dimension_numbers<[1], [0], [0], [1], [0, 0, 1, 1], [], []>} : vector<8x8xf32>, vector<8x128xf32>, vector<8x128xf32> -> vector<8x128xf32>
    %45 = arith.addf %42, %44 : vector<8x128xf32>
    %c24_32 = arith.constant 24 : index
    %c16_33 = arith.constant 16 : index
    %46 = vector.load %arg2[%c24_32, %c16_33] : memref<64x17xf32, #tpu.memory_space<vmem>>, vector<8x1xf32>
    %47 = vector.broadcast %46 : vector<8x1xf32> to vector<8x128xf32>
    %48 = arith.addf %45, %47 : vector<8x128xf32>
    %cst_34 = arith.constant 0.000000e+00 : f32
    %49 = vector.broadcast %cst_34 : f32 to vector<8x128xf32>
    %50 = arith.maximumf %48, %49 : vector<8x128xf32>
    %c32 = arith.constant 32 : index
    %c0_35 = arith.constant 0 : index
    %51 = vector.load %arg2[%c32, %c0_35] : memref<64x17xf32, #tpu.memory_space<vmem>>, vector<8x8xf32>
    %c2_i32_36 = arith.constant 2 : i32
    %52 = tpu.dynamic_rotate %50 by %c2_i32_36 dim 1 : vector<8x128xf32>, i32 -> vector<8x128xf32>
    %c1_37 = arith.constant 1 : index
    %c0_38 = arith.constant 0 : index
    %53 = vector.load %arg4[%c1_37, %c0_38] : memref<3x128xf32, #tpu.memory_space<vmem>>, vector<1x128xf32>
    %54 = vector.broadcast %53 : vector<1x128xf32> to vector<8x128xf32>
    %55 = arith.mulf %52, %54 : vector<8x128xf32>
    %cst_39 = arith.constant dense<0.000000e+00> : vector<8x128xf32>
    %56 = tpu.matmul %51, %55, %cst_39 {dimension_numbers = #tpu.dot_dimension_numbers<[1], [0], [0], [1], [0, 0, 1, 1], [], []>} : vector<8x8xf32>, vector<8x128xf32>, vector<8x128xf32> -> vector<8x128xf32>
    %c32_40 = arith.constant 32 : index
    %c8_41 = arith.constant 8 : index
    %57 = vector.load %arg2[%c32_40, %c8_41] : memref<64x17xf32, #tpu.memory_space<vmem>>, vector<8x8xf32>
    %cst_42 = arith.constant dense<0.000000e+00> : vector<8x128xf32>
    %58 = tpu.matmul %57, %50, %cst_42 {dimension_numbers = #tpu.dot_dimension_numbers<[1], [0], [0], [1], [0, 0, 1, 1], [], []>} : vector<8x8xf32>, vector<8x128xf32>, vector<8x128xf32> -> vector<8x128xf32>
    %59 = arith.addf %56, %58 : vector<8x128xf32>
    %c32_43 = arith.constant 32 : index
    %c16_44 = arith.constant 16 : index
    %60 = vector.load %arg2[%c32_43, %c16_44] : memref<64x17xf32, #tpu.memory_space<vmem>>, vector<8x1xf32>
    %61 = vector.broadcast %60 : vector<8x1xf32> to vector<8x128xf32>
    %62 = arith.addf %59, %61 : vector<8x128xf32>
    %cst_45 = arith.constant 0.000000e+00 : f32
    %63 = vector.broadcast %cst_45 : f32 to vector<8x128xf32>
    %64 = arith.maximumf %62, %63 : vector<8x128xf32>
    %65 = arith.addf %64, %36 : vector<8x128xf32>
    %cst_46 = arith.constant 0.000000e+00 : f32
    %66 = vector.broadcast %cst_46 : f32 to vector<8x128xf32>
    %67 = arith.maximumf %65, %66 : vector<8x128xf32>
    %c40 = arith.constant 40 : index
    %c0_47 = arith.constant 0 : index
    %68 = vector.load %arg2[%c40, %c0_47] : memref<64x17xf32, #tpu.memory_space<vmem>>, vector<1x8xf32>
    %c4_i32 = arith.constant 4 : i32
    %69 = tpu.dynamic_rotate %67 by %c4_i32 dim 1 : vector<8x128xf32>, i32 -> vector<8x128xf32>
    %c2 = arith.constant 2 : index
    %c0_48 = arith.constant 0 : index
    %70 = vector.load %arg4[%c2, %c0_48] : memref<3x128xf32, #tpu.memory_space<vmem>>, vector<1x128xf32>
    %71 = vector.broadcast %70 : vector<1x128xf32> to vector<8x128xf32>
    %72 = arith.mulf %69, %71 : vector<8x128xf32>
    %cst_49 = arith.constant dense<0.000000e+00> : vector<1x128xf32>
    %73 = tpu.matmul %68, %72, %cst_49 {dimension_numbers = #tpu.dot_dimension_numbers<[1], [0], [0], [1], [0, 0, 1, 1], [], []>} : vector<1x8xf32>, vector<8x128xf32>, vector<1x128xf32> -> vector<1x128xf32>
    %c40_50 = arith.constant 40 : index
    %c8_51 = arith.constant 8 : index
    %74 = vector.load %arg2[%c40_50, %c8_51] : memref<64x17xf32, #tpu.memory_space<vmem>>, vector<1x8xf32>
    %cst_52 = arith.constant dense<0.000000e+00> : vector<1x128xf32>
    %75 = tpu.matmul %74, %67, %cst_52 {dimension_numbers = #tpu.dot_dimension_numbers<[1], [0], [0], [1], [0, 0, 1, 1], [], []>} : vector<1x8xf32>, vector<8x128xf32>, vector<1x128xf32> -> vector<1x128xf32>
    %76 = arith.addf %73, %75 : vector<1x128xf32>
    %c40_53 = arith.constant 40 : index
    %c16_54 = arith.constant 16 : index
    %77 = vector.load %arg2[%c40_53, %c16_54] : memref<64x17xf32, #tpu.memory_space<vmem>>, vector<1x1xf32>
    %78 = vector.broadcast %77 : vector<1x1xf32> to vector<1x128xf32>
    %79 = arith.addf %76, %78 : vector<1x128xf32>
    %cst_55 = arith.constant 0.000000e+00 : f32
    %80 = vector.broadcast %cst_55 : f32 to vector<1x128xf32>
    %81 = arith.maximumf %79, %80 : vector<1x128xf32>
    %c48 = arith.constant 48 : index
    %c0_56 = arith.constant 0 : index
    %82 = vector.load %arg2[%c48, %c0_56] : memref<64x17xf32, #tpu.memory_space<vmem>>, vector<1x1xf32>
    %c4_i32_57 = arith.constant 4 : i32
    %83 = tpu.dynamic_rotate %81 by %c4_i32_57 dim 1 : vector<1x128xf32>, i32 -> vector<1x128xf32>
    %c2_58 = arith.constant 2 : index
    %c0_59 = arith.constant 0 : index
    %84 = vector.load %arg4[%c2_58, %c0_59] : memref<3x128xf32, #tpu.memory_space<vmem>>, vector<1x128xf32>
    %85 = arith.mulf %83, %84 : vector<1x128xf32>
    %86 = vector.broadcast %82 : vector<1x1xf32> to vector<1x128xf32>
    %87 = arith.mulf %86, %85 : vector<1x128xf32>
    %c48_60 = arith.constant 48 : index
    %c1_61 = arith.constant 1 : index
    %88 = vector.load %arg2[%c48_60, %c1_61] : memref<64x17xf32, #tpu.memory_space<vmem>>, vector<1x1xf32>
    %89 = vector.broadcast %88 : vector<1x1xf32> to vector<1x128xf32>
    %90 = arith.mulf %89, %81 : vector<1x128xf32>
    %91 = arith.addf %87, %90 : vector<1x128xf32>
    %c48_62 = arith.constant 48 : index
    %c2_63 = arith.constant 2 : index
    %92 = vector.load %arg2[%c48_62, %c2_63] : memref<64x17xf32, #tpu.memory_space<vmem>>, vector<1x1xf32>
    %93 = vector.broadcast %92 : vector<1x1xf32> to vector<1x128xf32>
    %94 = arith.addf %91, %93 : vector<1x128xf32>
    %cst_64 = arith.constant 0.000000e+00 : f32
    %95 = vector.broadcast %cst_64 : f32 to vector<1x128xf32>
    %96 = arith.maximumf %94, %95 : vector<1x128xf32>
    %c56 = arith.constant 56 : index
    %c0_65 = arith.constant 0 : index
    %97 = vector.load %arg2[%c56, %c0_65] : memref<64x17xf32, #tpu.memory_space<vmem>>, vector<1x8xf32>
    %cst_66 = arith.constant dense<0.000000e+00> : vector<1x128xf32>
    %98 = tpu.matmul %97, %67, %cst_66 {dimension_numbers = #tpu.dot_dimension_numbers<[1], [0], [0], [1], [0, 0, 1, 1], [], []>} : vector<1x8xf32>, vector<8x128xf32>, vector<1x128xf32> -> vector<1x128xf32>
    %c56_67 = arith.constant 56 : index
    %c8_68 = arith.constant 8 : index
    %99 = vector.load %arg2[%c56_67, %c8_68] : memref<64x17xf32, #tpu.memory_space<vmem>>, vector<1x1xf32>
    %100 = vector.broadcast %99 : vector<1x1xf32> to vector<1x128xf32>
    %101 = arith.addf %98, %100 : vector<1x128xf32>
    %102 = arith.addf %96, %101 : vector<1x128xf32>
    %cst_69 = arith.constant 0.000000e+00 : f32
    %103 = vector.broadcast %cst_69 : f32 to vector<1x128xf32>
    %104 = arith.maximumf %102, %103 : vector<1x128xf32>
    %c0_70 = arith.constant 0 : index
    %c0_71 = arith.constant 0 : index
    %105 = vector.load %arg7[%c0_70, %c0_71] : memref<1x128xf32, #tpu.memory_space<vmem>>, vector<1x128xf32>
    tpu.vector_store %arg7[%c0_70, %c0_71], %104 {strides = array<i32>} : memref<1x128xf32, #tpu.memory_space<vmem>>, vector<1x128xf32>,
    %c0_72 = arith.constant 0 : index
    %c0_73 = arith.constant 0 : index
    %106 = vector.load %arg7[%c0_72, %c0_73] : memref<1x128xf32, #tpu.memory_space<vmem>>, vector<1x16xf32>
    %c0_74 = arith.constant 0 : index
    %c0_75 = arith.constant 0 : index
    %107 = vector.load %arg6[%c0_74, %c0_75] : memref<8x16xf32, #tpu.memory_space<vmem>>, vector<1x16xf32>
    tpu.vector_store %arg6[%c0_74, %c0_75], %106 {strides = array<i32>} : memref<8x16xf32, #tpu.memory_space<vmem>>, vector<1x16xf32>,
    %c0_76 = arith.constant 0 : index
    %c16_77 = arith.constant 16 : index
    %108 = vector.load %arg7[%c0_76, %c16_77] : memref<1x128xf32, #tpu.memory_space<vmem>>, vector<1x16xf32>
    %c1_78 = arith.constant 1 : index
    %c0_79 = arith.constant 0 : index
    %109 = vector.load %arg6[%c1_78, %c0_79] : memref<8x16xf32, #tpu.memory_space<vmem>>, vector<1x16xf32>
    tpu.vector_store %arg6[%c1_78, %c0_79], %108 {strides = array<i32>} : memref<8x16xf32, #tpu.memory_space<vmem>>, vector<1x16xf32>,
    %c0_80 = arith.constant 0 : index
    %c32_81 = arith.constant 32 : index
    %110 = vector.load %arg7[%c0_80, %c32_81] : memref<1x128xf32, #tpu.memory_space<vmem>>, vector<1x16xf32>
    %c2_82 = arith.constant 2 : index
    %c0_83 = arith.constant 0 : index
    %111 = vector.load %arg6[%c2_82, %c0_83] : memref<8x16xf32, #tpu.memory_space<vmem>>, vector<1x16xf32>
    tpu.vector_store %arg6[%c2_82, %c0_83], %110 {strides = array<i32>} : memref<8x16xf32, #tpu.memory_space<vmem>>, vector<1x16xf32>,
    %c0_84 = arith.constant 0 : index
    %c48_85 = arith.constant 48 : index
    %112 = vector.load %arg7[%c0_84, %c48_85] : memref<1x128xf32, #tpu.memory_space<vmem>>, vector<1x16xf32>
    %c3 = arith.constant 3 : index
    %c0_86 = arith.constant 0 : index
    %113 = vector.load %arg6[%c3, %c0_86] : memref<8x16xf32, #tpu.memory_space<vmem>>, vector<1x16xf32>
    tpu.vector_store %arg6[%c3, %c0_86], %112 {strides = array<i32>} : memref<8x16xf32, #tpu.memory_space<vmem>>, vector<1x16xf32>,
    %c0_87 = arith.constant 0 : index
    %c64 = arith.constant 64 : index
    %114 = vector.load %arg7[%c0_87, %c64] : memref<1x128xf32, #tpu.memory_space<vmem>>, vector<1x16xf32>
    %c4_88 = arith.constant 4 : index
    %c0_89 = arith.constant 0 : index
    %115 = vector.load %arg6[%c4_88, %c0_89] : memref<8x16xf32, #tpu.memory_space<vmem>>, vector<1x16xf32>
    tpu.vector_store %arg6[%c4_88, %c0_89], %114 {strides = array<i32>} : memref<8x16xf32, #tpu.memory_space<vmem>>, vector<1x16xf32>,
    %c0_90 = arith.constant 0 : index
    %c80 = arith.constant 80 : index
    %116 = vector.load %arg7[%c0_90, %c80] : memref<1x128xf32, #tpu.memory_space<vmem>>, vector<1x16xf32>
    %c5 = arith.constant 5 : index
    %c0_91 = arith.constant 0 : index
    %117 = vector.load %arg6[%c5, %c0_91] : memref<8x16xf32, #tpu.memory_space<vmem>>, vector<1x16xf32>
    tpu.vector_store %arg6[%c5, %c0_91], %116 {strides = array<i32>} : memref<8x16xf32, #tpu.memory_space<vmem>>, vector<1x16xf32>,
    %c0_92 = arith.constant 0 : index
    %c96 = arith.constant 96 : index
    %118 = vector.load %arg7[%c0_92, %c96] : memref<1x128xf32, #tpu.memory_space<vmem>>, vector<1x16xf32>
    %c6 = arith.constant 6 : index
    %c0_93 = arith.constant 0 : index
    %119 = vector.load %arg6[%c6, %c0_93] : memref<8x16xf32, #tpu.memory_space<vmem>>, vector<1x16xf32>
    tpu.vector_store %arg6[%c6, %c0_93], %118 {strides = array<i32>} : memref<8x16xf32, #tpu.memory_space<vmem>>, vector<1x16xf32>,
    %c0_94 = arith.constant 0 : index
    %c112 = arith.constant 112 : index
    %120 = vector.load %arg7[%c0_94, %c112] : memref<1x128xf32, #tpu.memory_space<vmem>>, vector<1x16xf32>
    %c7 = arith.constant 7 : index
    %c0_95 = arith.constant 0 : index
    %121 = vector.load %arg6[%c7, %c0_95] : memref<8x16xf32, #tpu.memory_space<vmem>>, vector<1x16xf32>
    tpu.vector_store %arg6[%c7, %c0_95], %120 {strides = array<i32>} : memref<8x16xf32, #tpu.memory_space<vmem>>, vector<1x16xf32>,
    %c0_96 = arith.constant 0 : index
    %c0_97 = arith.constant 0 : index
    %122 = vector.load %arg6[%c0_96, %c0_97] : memref<8x16xf32, #tpu.memory_space<vmem>>, vector<8x16xf32>
    %c0_98 = arith.constant 0 : index
    %c0_99 = arith.constant 0 : index
    %123 = vector.load %arg3[%c0_98, %c0_99] : memref<24x5xf32, #tpu.memory_space<vmem>>, vector<16x5xf32>
    %cst_100 = arith.constant dense<0.000000e+00> : vector<8x5xf32>
    %124 = tpu.matmul %122, %123, %cst_100 {dimension_numbers = #tpu.dot_dimension_numbers<[1], [0], [0], [1], [0, 0, 1, 1], [], []>} : vector<8x16xf32>, vector<16x5xf32>, vector<8x5xf32> -> vector<8x5xf32>
    %c16_101 = arith.constant 16 : index
    %c0_102 = arith.constant 0 : index
    %125 = vector.load %arg3[%c16_101, %c0_102] : memref<24x5xf32, #tpu.memory_space<vmem>>, vector<1x5xf32>
    %126 = vector.broadcast %125 : vector<1x5xf32> to vector<8x5xf32>
    %127 = arith.addf %124, %126 : vector<8x5xf32>
    %c0_103 = arith.constant 0 : index
    %c0_104 = arith.constant 0 : index
    %128 = vector.load %arg5[%c0_103, %c0_104] : memref<8x5xf32, #tpu.memory_space<vmem>>, vector<8x5xf32>
    tpu.vector_store %arg5[%c0_103, %c0_104], %127 {strides = array<i32>} : memref<8x5xf32, #tpu.memory_space<vmem>>, vector<8x5xf32>,
    return
  }
  func.func @transform_0(%arg0: i32) -> (i32, i32) {
    %c0_i32 = arith.constant 0 : i32
    %c0_i32_0 = arith.constant 0 : i32
    return %c0_i32, %arg0 : i32, i32
  }
  func.func @transform_1(%arg0: i32) -> (i32, i32) {
    %c0_i32 = arith.constant 0 : i32
    %c0_i32_0 = arith.constant 0 : i32
    %c0_i32_1 = arith.constant 0 : i32
    return %c0_i32, %c0_i32_0 : i32, i32
  }
  func.func @transform_2(%arg0: i32) -> (i32, i32) {
    %c0_i32 = arith.constant 0 : i32
    %c0_i32_0 = arith.constant 0 : i32
    %c0_i32_1 = arith.constant 0 : i32
    return %c0_i32, %c0_i32_0 : i32, i32
  }
  func.func @transform_3(%arg0: i32) -> (i32, i32) {
    %c0_i32 = arith.constant 0 : i32
    %c0_i32_0 = arith.constant 0 : i32
    %c0_i32_1 = arith.constant 0 : i32
    return %c0_i32, %c0_i32_0 : i32, i32
  }
  func.func @transform_4(%arg0: i32) -> (i32, i32) {
    %c0_i32 = arith.constant 0 : i32
    %c0_i32_0 = arith.constant 0 : i32
    return %arg0, %c0_i32 : i32, i32
  }
}

</mosaic_0001>

<bundles_post_ra>
// kernel: tpu_custom_call.1
= control target key start
LH: loop header
LB: loop body
LE: loop exit
PB: predicated region body
PF: predicated region fallthrough
CT: control target
= control target key end

     0   :  { %s1622_s15 = smov 0   ;;  %s1762_s0 = inlined_call_operand.vmem [shape: f32[4,256], index: 0, kind: input, shape index: {}]   ;;  %s1763_s1 = inlined_call_operand.vmem [shape: f32[64,17], index: 1, kind: input, shape index: {}]   ;;  %s1764_s2 = inlined_call_operand.vmem [shape: f32[24,5], index: 2, kind: input, shape index: {}]   ;;  %s1765_s3 = inlined_call_operand.vmem [shape: f32[3,128], index: 3, kind: input, shape index: {}]   ;;  %s1766_s4 = inlined_call_operand.vmem [shape: f32[16,5], index: 4, kind: output, shape index: {}]  }
   0x1 LB: > { %s1398_s16 = sadd.s32 4294967295, %s1574_s15   ;;  %p1402_p0 = scmp.ge.s32.totalorder %s1574_s15, 1  ;;  %s1574_s15 = sphi %s1622_s15, %s14_s15  }
   0x2   : > { %p161_p1 = scmp.lt.s32.totalorder %s1574_s15, 3 }
   0x4   : > { %p162_p2 = pnand %p1402_p0, %p161_p1 }
   0x5   : > { %p185_p3 = scmp.lt.s32.totalorder (!%p162_p2), %s1398_s16, 1  ;;  %v1576_v0 = vmov (!%p162_p2), 0.0   ;;  %vm1577_vm0 = vmmov (!%p162_p2), 0   ;;  %v194_v1 = vld [vmem:[%s1763_s1] sm:$0xff] (!%p162_p2)  ;;  %v1578_v2 = vmov (!%p162_p2), 8   ;;  %vm209_vm1 = vcmask (!%p162_p2), 1043456  }
   0x6   : > { %165 = sbr.rel (%p162_p2) target bundleno = 2195 (0x893), region = 36  ;;  %1465 = vmatprep.subr.mxu1 (!%p162_p2), %v1576_v0  ;;  %1460 = vmatprep.subr.mxu0 (!%p162_p2), %v1576_v0  ;;  %s1579_s23 = smov (!%p162_p2), 1   ;;  %v1405_v4 = vld [vmem:[%s1765_s3] ss:$0 sm:$0xff] (!%p162_p2)  ;;  %vm206_vm2 = vcmask (!%p162_p2), 31744   ;;  %v364_v8 = vld [vmem:[%s1763_s1 + $0x8] sm:$0xff] (!%p162_p2) }
   0x7   : > { %1467 = vmatprep.mubr.msk.f32.mxu1 (!%p162_p2), %vm1577_vm0, %v1576_v0  ;;  %1462 = vmatprep.mubr.msk.f32.mxu0 (!%p162_p2), %vm1577_vm0, %v1576_v0  ;;  %s1580_s24 = smov (!%p162_p2), 124   ;;  %s1581_s29 = smov (!%p162_p2), 120   ;;  %v522_v9 = vld [vmem:[%s1763_s1 + $0x10] sm:$0xff] (!%p162_p2)  ;;  %v1582_v10 = vmov (!%p162_p2), 16   ;;  %v1583_v11 = vmov (!%p162_p2), 4   ;;  %vm371_vm3 = vcmask (!%p162_p2), 64512  }
   0x8   : > { %1559 = vset.pattern.permute.xlu1 (!%p162_p2), %v1578_v2  ;;  %1561 = vset.pattern.permute.xlu0 (!%p162_p2), %v1583_v11  ;;  %v602_v24 = vld [vmem:[%s1763_s1 + $0x18] sm:$0xff] (!%p162_p2)  ;;  %v764_v33 = vld [vmem:[%s1763_s1 + $0x20] sm:$0xff] (!%p162_p2)  ;;  %s1584_s10 = smov (!%p162_p2), 2   ;;  %v1702_v43 = vld [vmem:[%s1763_s1 + $0x28] sm:$0x1] (!%p162_p2)  ;;  %s1585_s17 = smov (!%p162_p2), 4  }
   0x9   : > { %359 = vperm.xlu1 (!%p162_p2), %1559, %v194_v1   ;;  %v1414_v39 = vld [vmem:[%s1765_s3 + $0x1] ss:$0 sm:$0xff] (!%p162_p2)  ;;  %vm1189_vm4 = vcmask (!%p162_p2), 122880   ;;  %s1589_s26 = smov (!%p162_p2), 96   ;;  %s1590_s27 = smov (!%p162_p2), 112   ;;  %vm1269_vm5 = vcmask (!%p162_p2), 130048  }
   0xa   : > { %s1592_s30 = smov (!%p162_p2), 64   ;;  %s1593_s5 = smov (!%p162_p2), 80   ;;  %vm1343_vm6 = vcmask (!%p162_p2), 39936  }
   0xb   : > { %s1594_s6 = smov (!%p162_p2), 32   ;;  %s1595_s7 = smov (!%p162_p2), 48  }
   0xc   : > { %s1596_s8 = smov (!%p162_p2), 16  }
   0xd   : > { %s1768_s16 = smov (!%p185_p3, %s1398_s16), 1  ;;  %1560 = vset.pattern.permute.xlu1 %v1582_v10 }
   0xe   : > { %s1403_s19 = sshll.u32 %s1768_s16, 2  ;;  %s1404_s9 = sshll.u32 %s1768_s16, 3 }
   0xf   : > { %s188_s22 = scalar_lea.vmem %s1762_s0, %s1403_s19  ;;  %s192_s14 = scalar_lea.vmem %s1766_s4, %s1404_s9 }
  0x10   : > { %v193_v3 = vld [vmem:[%s188_s22] sm:$0xf] }
  0x11   : > { %195 = vrot.lane.b32.xlu0 %v193_v3, %s1579_s23  ;;  %1461 = vmatpush3.msk.msra.mxu0 %vm209_vm1, %v193_v3 }
  0x12   : > { %1470 = vmatprep.subr.mxu0 %v1576_v0 }
  0x15   : > { %204 = vrot.lane.b32.xlu0 %v194_v1, %s1580_s24 }
  0x19   : > { %369 = vrot.lane.b32.xlu0 %v364_v8, %s1581_s29 }
  0x1d   : > { %525 = vperm.xlu0 %1561, %v522_v9  }
  0x21   : > { %1562 = vset.pattern.permute.xlu0 %v1582_v10 }
  0x22   : > { %759 = vperm.xlu0 %1562, %v602_v24  }
  0x26   : > { %916 = vperm.xlu0 %1562, %v764_v33  }
  0x2a   : > { %933 = vrot.lane.b32.xlu0 %v1702_v43, %s1581_s29 }
  0x83   : > { %v196_v5 = vpop.permute.xlu0 %195 }
  0x84   : > { %v202_v6 = vmul.f32 %v1405_v4, %v196_v5  ;;  %v1085_v5 = vld [vmem:[%s1763_s1 + $0x30] sm:$0x1] }
  0x86   : > { %1466 = vmatpush3.msk.msra.mxu1 %vm209_vm1, %v202_v6  ;;  %v1586_v6 = vmov 0  }
  0x87   : > { %1468 = vmatmul.mubr.msk.f32.vlgmr.msra.gmra.mrb[0].mxu1 %vm206_vm2, %v194_v1  ;;  %v205_v7 = vpop.permute.xlu0 %204  ;;  %1475 = vmatprep.subr.mxu1 %v1576_v0 }
  0x88   : > { %1463 = vmatmul.mubr.msk.f32.vlgmr.msra.gmra.mrb[0].mxu0 %vm206_vm2, %v205_v7  ;;  %1477 = vmatprep.mubr.msk.f32.mxu1 %vm1577_vm0, %v1576_v0  ;;  %v360_v13 = vpop.permute.xlu1 %359  ;;  %v1587_v7 = vmov 1  }
  0x89   : > { %1472 = vmatprep.mubr.msk.f32.mxu0 %vm1577_vm0, %v1576_v0  ;;  %1563 = vset.pattern.permute.xlu0 %v1586_v6 }
  0x8a   : > { %1091 = vperm.xlu0 %1563, %v1085_v5  }
  0x8b   : > { %v370_v20 = vpop.permute.xlu0 %369 }
  0x8e   : > { %1567 = vset.pattern.permute.xlu0 %v1578_v2 }
  0x9c   : > { %v526_v30 = vpop.permute.xlu0 %525 }
  0xa1   : > { %v760_v49 = vpop.permute.xlu0 %759 }
  0xa5   : > { %v917_v60 = vpop.permute.xlu0 %916 }
 0x15a   : > { %v354_v12 = vpop.f32.mrb[0].mxu1 }
 0x15b   : > { %v279_v14 = vpop.f32.mrb[0].mxu0  ;;  %v1469_v15 = vpop.f32.mrb[1].mxu1 }
 0x15c   : > { %v355_v16 = vadd.f32 %v354_v12, %v279_v14  ;;  %v1464_v17 = vpop.f32.mrb[1].mxu0  ;;  %v926_v12 = vld [vmem:[%s1765_s3 + $0x2] sm:$0x1] }
 0x15e   : > { %v362_v18 = vadd.f32 %v360_v13, %v355_v16 }
 0x160   : > { %v363_v19 = vmax.f32 %v362_v18, 0.0 }
 0x162   : > { %365 = vrot.lane.b32.xlu1 %v363_v19, %s1579_s23  ;;  %1471 = vmatpush3.msra.mxu0 %v363_v19 }
 0x163   : > { %1473 = vmatmul.mubr.msk.f32.vlgmr.msra.gmra.mrb[2].mxu0 %vm371_vm3, %v370_v20  ;;  %1480 = vmatprep.subr.mxu0 %v1576_v0 }
 0x164   : > { %1481 = vmatpush3.msk.msra.mxu0 %vm209_vm1, %v193_v3  ;;  %1482 = vmatprep.mubr.msk.f32.mxu0 %vm1577_vm0, %v1576_v0  ;;  %v934_v3 = vpop.permute.xlu0 %933 }
 0x165   : > { %1490 = vmatprep.subr.mxu0 %v1576_v0 }
 0x166   : > { %517 = vperm.xlu1 %1560, %v364_v8  }
 0x167   : > { %1483 = vmatmul.mubr.msk.f32.vlgmr.msra.gmra.mrb[4].mxu0 %vm206_vm2, %v522_v9  ;;  %v927_v9 = vlaneseq }
 0x168   : > { %1492 = vmatprep.mubr.msk.f32.mxu0 %vm1577_vm0, %v1576_v0 }
 0x169   : > { %v928_v10 = vshrl.u32 %v927_v9, 7 }
 0x16b   : > { %v929_v11 = vsub.s32 0, %v928_v10 }
 0x16d   : > { %v930_v13 = vrot.slane %v926_v12, %v929_v11 }
 0x1d4   : > { %v366_v21 = vpop.permute.xlu1 %365 }
 0x1d5   : > { %v367_v22 = vmul.f32 %v1405_v4, %v366_v21  ;;  %v1107_v4 = vld [vmem:[%s1763_s1 + $0x38] sm:$0x1] }
 0x1d7   : > { %1476 = vmatpush3.msra.mxu1 %v367_v22 }
 0x1d8   : > { %1478 = vmatmul.mubr.msk.f32.vlgmr.msra.gmra.mrb[2].mxu1 %vm371_vm3, %v364_v8  ;;  %1485 = vmatprep.subr.mxu1 %v1576_v0  ;;  %v1588_v8 = vmov 2  }
 0x1d9   : > { %1487 = vmatprep.mubr.msk.f32.mxu1 %vm1577_vm0, %v1576_v0 }
 0x1e5   : > { %v518_v28 = vpop.permute.xlu1 %517 }
 0x236   : > { %v440_v23 = vpop.f32.mrb[2].mxu0 }
 0x237   : > { %v1474_v25 = vpop.f32.mrb[3].mxu0 }
 0x23a   : > { %v596_v26 = vpop.f32.mrb[4].mxu0 }
 0x23b   : > { %v1484_v27 = vpop.f32.mrb[5].mxu0  ;;  %v597_v35 = vadd.f32 %v596_v26, %v526_v30  ;;  %v1092_v26 = vpop.permute.xlu0 %1091 }
 0x2ab   : > { %v512_v29 = vpop.f32.mrb[2].mxu1 }
 0x2ac   : > { %v513_v31 = vadd.f32 %v512_v29, %v440_v23  ;;  %v1479_v32 = vpop.f32.mrb[3].mxu1 }
 0x2ae   : > { %v520_v34 = vadd.f32 %v518_v28, %v513_v31 }
 0x2b0   : > { %v521_v36 = vmax.f32 %v520_v34, 0.0 }
 0x2b2   : > { %v600_v37 = vadd.f32 %v597_v35, %v521_v36 }
 0x2b4   : > { %v601_v38 = vmax.f32 %v600_v37, 0.0 }
 0x2b6   : > { %603 = vrot.lane.b32.xlu1 %v601_v38, %s1584_s10  ;;  %1486 = vmatpush3.msra.mxu1 %v601_v38 }
 0x2b7   : > { %1495 = vmatprep.subr.mxu1 %v1576_v0 }
 0x2ba   : > { %612 = vrot.lane.b32.xlu1 %v602_v24, %s1581_s29 }
 0x328   : > { %v604_v40 = vpop.permute.xlu1 %603 }
 0x329   : > { %v610_v41 = vmul.f32 %v1414_v39, %v604_v40  ;;  %v1262_v40 = vld [vmem:[%s1764_s2] sm:$0xff] }
 0x32b   : > { %1491 = vmatpush3.msra.mxu0 %v610_v41  ;;  %v1263_v41 = vld [vmem:[%s1764_s2 + $0x8] sm:$0xff] }
 0x32c   : > { %1493 = vmatmul.mubr.msk.f32.vlgmr.msra.gmra.mrb[6].mxu0 %vm371_vm3, %v602_v24  ;;  %v613_v42 = vpop.permute.xlu1 %612  ;;  %1500 = vmatprep.subr.mxu0 %v1576_v0 }
 0x32d   : > { %1488 = vmatmul.mubr.msk.f32.vlgmr.msra.gmra.mrb[4].mxu1 %vm371_vm3, %v613_v42  ;;  %1502 = vmatprep.mubr.msk.f32.mxu0 %vm1577_vm0, %v1576_v0  ;;  %v1591_v42 = vmov 0.0|0.0  }
 0x32e   : > { %1497 = vmatprep.mubr.msk.f32.mxu1 %vm1577_vm0, %v1576_v0 }
 0x3ff   : > { %v754_v44 = vpop.f32.mrb[6].mxu0 }
 0x400   : > { %v682_v45 = vpop.f32.mrb[4].mxu1  ;;  %v1494_v46 = vpop.f32.mrb[7].mxu0 }
 0x401   : > { %v755_v47 = vadd.f32 %v754_v44, %v682_v45  ;;  %v1489_v48 = vpop.f32.mrb[5].mxu1 }
 0x403   : > { %v762_v50 = vadd.f32 %v760_v49, %v755_v47 }
 0x405   : > { %v763_v51 = vmax.f32 %v762_v50, 0.0 }
 0x407   : > { %765 = vrot.lane.b32.xlu1 %v763_v51, %s1584_s10  ;;  %1496 = vmatpush3.msra.mxu1 %v763_v51 }
 0x408   : > { %1505 = vmatprep.subr.mxu1 %v1576_v0 }
 0x40b   : > { %769 = vrot.lane.b32.xlu1 %v764_v33, %s1581_s29 }
 0x479   : > { %v766_v52 = vpop.permute.xlu1 %765 }
 0x47a   : > { %v767_v53 = vmul.f32 %v1414_v39, %v766_v52  ;;  %v1429_v52 = vld [vmem:[%s1764_s2 + $0x10] ss:$0 sm:$0xff] }
 0x47c   : > { %1501 = vmatpush3.msra.mxu0 %v767_v53 }
 0x47d   : > { %1503 = vmatmul.mubr.msk.f32.vlgmr.msra.gmra.mrb[8].mxu0 %vm371_vm3, %v764_v33  ;;  %v770_v54 = vpop.permute.xlu1 %769  ;;  %1510 = vmatprep.subr.mxu0 %v1576_v0 }
 0x47e   : > { %1498 = vmatmul.mubr.msk.f32.vlgmr.msra.gmra.mrb[6].mxu1 %vm371_vm3, %v770_v54  ;;  %1512 = vmatprep.mubr.msk.f32.mxu0 %vm1577_vm0, %v1576_v0 }
 0x47f   : > { %1507 = vmatprep.mubr.msk.f32.mxu1 %vm1577_vm0, %v1576_v0 }
 0x550   : > { %v911_v55 = vpop.f32.mrb[8].mxu0 }
 0x551   : > { %v839_v56 = vpop.f32.mrb[6].mxu1  ;;  %v1504_v57 = vpop.f32.mrb[9].mxu0 }
 0x552   : > { %v912_v58 = vadd.f32 %v911_v55, %v839_v56  ;;  %v1499_v59 = vpop.f32.mrb[7].mxu1 }
 0x554   : > { %v919_v61 = vadd.f32 %v917_v60, %v912_v58 }
 0x556   : > { %v920_v62 = vmax.f32 %v919_v61, 0.0 }
 0x558   : > { %v921_v63 = vadd.f32 %v920_v62, %v601_v38 }
 0x55a   : > { %v922_v1 = vmax.f32 %v921_v63, 0.0 }
 0x55c   : > { %924 = vrot.lane.b32.xlu1 %v922_v1, %s1585_s17  ;;  %1506 = vmatpush3.msra.mxu1 %v922_v1 }
 0x55d   : > { %1515 = vmatprep.subr.mxu1 %v1576_v0  ;;  %1508 = vmatmul.mubr.msk.f32.vlgmr.msra.gmra.mrb[8].mxu1 %vm371_vm3, %v934_v3 }
 0x55e   : > { %1516 = vmatpush3.msra.mxu1 %v922_v1  ;;  %1517 = vmatprep.mubr.msk.f32.mxu1 %vm1577_vm0, %v1576_v0 }
 0x560   : > { %1080 = vperm.xlu1 %1560, %v1702_v43  }
 0x561   : > { %1518 = vmatmul.mubr.msk.f32.vlgmr.msra.gmra.mrb[10].mxu1 %vm371_vm3, %v1107_v4 }
 0x564   : > { %1564 = vset.pattern.permute.xlu1 %v1587_v7 }
 0x565   : > { %1096 = vperm.xlu1 %1564, %v1085_v5  }
 0x569   : > { %1565 = vset.pattern.permute.xlu1 %v1588_v8 }
 0x56a   : > { %1102 = vperm.xlu1 %1565, %v1085_v5  }
 0x56e   : > { %1566 = vset.pattern.permute.xlu1 %v1578_v2 }
 0x56f   : > { %1110 = vperm.xlu1 %1566, %v1107_v4  }
 0x5ce   : > { %v925_v14 = vpop.permute.xlu1 %924 }
 0x5cf   : > { %v931_v15 = vmul.f32 %v930_v13, %v925_v14 }
 0x5d1   : > { %1511 = vmatpush3.msra.mxu0 %v931_v15 }
 0x5d2   : > { %1513 = vmatmul.mubr.msk.f32.vlgmr.msra.gmra.mrb[10].mxu0 %vm371_vm3, %v1702_v43  ;;  %1527 = vmatprep.subr.bf16.mxu0 %v1591_v42  ;;  %v1528_v43 = vpack.c.bf16 %v1263_v41, %v1262_v40 }
 0x5d3   : > { %1524 = vmatprep.mubr.msk.f32.mxu0 %vm1577_vm0, %v1576_v0 }
 0x5d4   : > { %1529 = vmatpush3.bf16.msra.mxu0 %v1528_v43 }
 0x5df   : > { %v1081_v21 = vpop.permute.xlu1 %1080 }
 0x5e4   : > { %v1097_v25 = vpop.permute.xlu1 %1096 }
 0x5e9   : > { %v1103_v27 = vpop.permute.xlu1 %1102 }
 0x5ee   : > { %v1111_v0 = vpop.permute.xlu1 %1110 }
 0x630   : > { %v1003_v16 = vpop.f32.mrb[8].mxu1 }
 0x631   : > { %v1509_v2 = vpop.f32.mrb[9].mxu1 }
 0x634   : > { %v1181_v18 = vpop.f32.mrb[10].mxu1 }
 0x635   : > { %v1519_v22 = vpop.f32.mrb[11].mxu1  ;;  %v1182_v34 = vadd.f32 %v1181_v18, %v1111_v0 }
 0x6a5   : > { %v1075_v17 = vpop.f32.mrb[10].mxu0 }
 0x6a6   : > { %v1076_v19 = vadd.f32 %v1075_v17, %v1003_v16  ;;  %v1514_v20 = vpop.f32.mrb[11].mxu0 }
 0x6a8   : > { %v1083_v23 = vadd.f32 %v1081_v21, %v1076_v19 }
 0x6aa   : > { %v1084_v24 = vmax.f32 %v1083_v23, 0.0 }
 0x6ac   : > { %1086 = vrot.lane.b32.xlu0 %v1084_v24, %s1585_s17  ;;  %v1099_v30 = vmul.f32 %v1097_v25, %v1084_v24 }
 0x71e   : > { %v1087_v28 = vpop.permute.xlu0 %1086 }
 0x71f   : > { %v1088_v29 = vmul.f32 %v1087_v28, %v926_v12 }
 0x721   : > { %v1094_v31 = vmul.f32 %v1092_v26, %v1088_v29 }
 0x723   : > { %v1100_v32 = vadd.f32 %v1099_v30, %v1094_v31 }
 0x725   : > { %v1105_v33 = vadd.f32 %v1103_v27, %v1100_v32 }
 0x727   : > { %v1106_v35 = vmax.f32 %v1105_v33, 0.0 }
 0x729   : > { %v1185_v36 = vadd.f32 %v1182_v34, %v1106_v35 }
 0x72b   : > { %v1186_v37 = vmax.f32 %v1185_v36, 0.0 }
 0x72d   : > { %1187 = vst [vmem:[#allocation3] sm:$0x1] %v1186_v37 }
 0x734   : > { %v1423_v38 = vld [vmem:[#allocation3] ss:$0 sm:$0xff] }
 0x735   : > { %v1188_v39 = vld [vmem:[#allocation3] sm:$0x1]  ;;  %1207 = vrot.lane.b32.xlu1 %v1423_v38, %s1589_s26  ;;  %1197 = vrot.lane.b32.xlu0 %v1423_v38, %s1590_s27 }
 0x736   : > { %1190 = vst.msk [vmem:[#allocation2] sm:$0x1] %vm1189_vm4, %v1188_v39 }
 0x739   : > { %1227 = vrot.lane.b32.xlu1 %v1423_v38, %s1592_s30  ;;  %1217 = vrot.lane.b32.xlu0 %v1423_v38, %s1593_s5 }
 0x73d   : > { %1247 = vrot.lane.b32.xlu1 %v1423_v38, %s1594_s6  ;;  %1237 = vrot.lane.b32.xlu0 %v1423_v38, %s1595_s7 }
 0x741   : > { %1257 = vrot.lane.b32.xlu0 %v1423_v38, %s1596_s8 }
 0x7a7   : > { %v1208_v44 = vpop.permute.xlu1 %1207  ;;  %v1198_v45 = vpop.permute.xlu0 %1197 }
 0x7a8   : > { %1210 = vst.msk [vmem:[#allocation2 + $0x2] sm:$0x1] %vm1189_vm4, %v1208_v44  ;;  %1200 = vst.msk [vmem:[#allocation2 + $0x1] sm:$0x1] %vm1189_vm4, %v1198_v45 }
 0x7ab   : > { %v1228_v46 = vpop.permute.xlu1 %1227  ;;  %v1218_v47 = vpop.permute.xlu0 %1217 }
 0x7ac   : > { %1230 = vst.msk [vmem:[#allocation2 + $0x4] sm:$0x1] %vm1189_vm4, %v1228_v46  ;;  %1220 = vst.msk [vmem:[#allocation2 + $0x3] sm:$0x1] %vm1189_vm4, %v1218_v47 }
 0x7af   : > { %v1248_v48 = vpop.permute.xlu1 %1247  ;;  %v1238_v49 = vpop.permute.xlu0 %1237 }
 0x7b0   : > { %1250 = vst.msk [vmem:[#allocation2 + $0x6] sm:$0x1] %vm1189_vm4, %v1248_v48  ;;  %1240 = vst.msk [vmem:[#allocation2 + $0x5] sm:$0x1] %vm1189_vm4, %v1238_v49 }
 0x7b3   : > { %v1258_v50 = vpop.permute.xlu0 %1257 }
 0x7b4   : > { %1260 = vst.msk [vmem:[#allocation2 + $0x7] sm:$0x1] %vm1189_vm4, %v1258_v50 }
 0x7bb   : > { %v1261_v51 = vld [vmem:[#allocation2] sm:$0xff] }
 0x7bc   : > { %1525 = vmatmul.mubr.msk.f32.vlgmr.msra.gmra.mrb[12].mxu0 %vm1269_vm5, %v1261_v51 }
 0x88f   : > { %v1339_v53 = vpop.f32.mrb[12].mxu0 }
 0x890   : > { %v1340_v54 = vadd.f32 %v1429_v52, %v1339_v53  ;;  %v1526_v55 = vpop.f32.mrb[13].mxu0 }
 0x892   : > { %1344 = vst.msk [vmem:[%s192_s14] sm:$0xff] %vm1343_vm6, %v1340_v54 }
 0x893 PF: > { %s14_s15 = sadd.s32 1, %s1574_s15  }
 0x894   : > { %p11_p4 = scmp.ge.s32.totalorder %s14_s15, 4  }
 0x896   :  { %13 = sbr.rel (!%p11_p4) target bundleno = 1 (0x1), region = 66 }

</bundles_post_ra>
